<compile_context>
chip_gen: v7x
topology: tpu7x:2x2x1
jax: 0.10.0
libtpu: 0.0.40
codegen_flags: <defaults>
</compile_context>

<pallas_src>
import functools

import jax
import jax.numpy as jnp
from jax import lax
from jax.experimental import pallas as pl
from jax.experimental.pallas import tpu as pltpu


# --------------------------------------------------------------------------
# Path A: VMEM-resident embedding table (small / medium vocabularies)
# --------------------------------------------------------------------------
def _resident_table_kernel(ids_ref,     # SMEM scalar prefetch: (N_pad,) int32
                           table_ref,   # VMEM resident: (V, H)
                           gamma_ref,   # VMEM resident: (1, H) f32
                           beta_ref,    # VMEM resident: (1, H) f32
                           out_ref,     # VMEM out tile: (TB, H)
                           gather_buf,  # VMEM scratch:  (TB, H)
                           *, eps, block_tokens):
    step = pl.program_id(0)
    base = step * block_tokens
    n_groups = block_tokens // 8        # static

    def gather_group(g, carry):
        # 8 scattered row loads (dynamic sublane offsets), assembled into one
        # (8, H) slab so the store is a single aligned vst.
        rows = []
        for r in range(8):
            tid = ids_ref[base + g * 8 + r]
            rows.append(table_ref[pl.ds(tid, 1), :])
        grp = jnp.concatenate(rows, axis=0)              # (8, H)
        off = pl.multiple_of(g * 8, 8)
        gather_buf[pl.ds(off, 8), :] = grp
        return carry

    lax.fori_loop(0, n_groups, gather_group, 0)

    # LayerNorm over the hidden axis, accumulated in f32.
    x = gather_buf[...].astype(jnp.float32)
    mean = jnp.mean(x, axis=-1, keepdims=True)
    centered = x - mean
    var = jnp.mean(centered * centered, axis=-1, keepdims=True)
    inv = lax.rsqrt(var + eps)
    y = centered * inv * gamma_ref[...] + beta_ref[...]
    # Dropout with the module default p=0 is the identity.
    # TODO(synk): training-mode dropout (hidden_dropout_prob > 0) not implemented.
    out_ref[...] = y.astype(out_ref.dtype)


# --------------------------------------------------------------------------
# Path B: table stays in HBM, double-buffered chunked row gather
# --------------------------------------------------------------------------
def _hbm_gather_kernel(ids_ref,      # SMEM scalar prefetch: (N_pad,) int32
                       emb_hbm,      # pl.ANY / HBM: (V, H)
                       gamma_ref,    # VMEM resident: (1, H) f32
                       beta_ref,     # VMEM resident: (1, H) f32
                       out_ref,      # VMEM out tile: (TB, H)
                       gather_buf,   # VMEM scratch:  (2, C, H)
                       copy_sems,    # DMA sems:      (2,)
                       *, eps, block_tokens, chunk):
    step = pl.program_id(0)
    base = step * block_tokens
    n_chunks = block_tokens // chunk     # static

    def issue_chunk(chunk_start, slot):
        # All of this chunk's row copies share one semaphore (per slot).
        def issue_row(j, carry):
            tid = ids_ref[base + chunk_start + j]
            pltpu.make_async_copy(
                emb_hbm.at[pl.ds(tid, 1), :],
                gather_buf.at[slot, pl.ds(j, 1), :],
                copy_sems.at[slot],
            ).start()
            return carry
        lax.fori_loop(0, chunk, issue_row, 0)

    def wait_chunk(slot):
        # Each wait drains exactly one row-copy's worth from the slot's sem.
        def wait_row(j, carry):
            pltpu.make_async_copy(
                emb_hbm.at[pl.ds(0, 1), :],
                gather_buf.at[slot, pl.ds(0, 1), :],
                copy_sems.at[slot],
            ).wait()
            return carry
        lax.fori_loop(0, chunk, wait_row, 0)

    issue_chunk(0, 0)                    # prime slot 0
    for c in range(n_chunks):            # static loop -> slot is a Python int
        slot = c % 2
        wait_chunk(slot)
        if c + 1 < n_chunks:             # prefetch next chunk behind compute
            issue_chunk((c + 1) * chunk, 1 - slot)

        x = gather_buf[slot].astype(jnp.float32)       # (C, H)
        mean = jnp.mean(x, axis=-1, keepdims=True)
        centered = x - mean
        var = jnp.mean(centered * centered, axis=-1, keepdims=True)
        inv = lax.rsqrt(var + eps)
        y = centered * inv * gamma_ref[...] + beta_ref[...]
        # Dropout(p=0) is the identity.
        out_ref[pl.ds(c * chunk, chunk), :] = y.astype(out_ref.dtype)


# --------------------------------------------------------------------------
# Wrapper
# --------------------------------------------------------------------------
def _vmem_capacity_bytes():
    try:
        return int(pltpu.get_tpu_info().vmem_capacity_bytes)
    except Exception:
        return 64 * 2**20     # conservative (v7x per-TensorCore VMEM)


def transtab_word_embedding(input_ids, emb_table, gamma, beta, *,
                            eps=1e-5,
                            block_tokens=256,
                            gather_chunk=32,
                            resident_table_limit_bytes=None,
                            force_hbm_gather=False):
    """input_ids: int[...], emb_table: [V, H], gamma/beta: [H] -> [..., H]."""
    orig_shape = input_ids.shape
    V, H = emb_table.shape
    itemsize = jnp.dtype(emb_table.dtype).itemsize
    table_bytes = V * H * itemsize

    vmem_cap = _vmem_capacity_bytes()
    if resident_table_limit_bytes is None:
        # ~16 MiB on v7x (64 MiB VMEM), ~32 MiB on v5e/v6e (128 MiB VMEM),
        # leaving room for the table's double buffer + output tiles + scratch.
        resident_table_limit_bytes = vmem_cap // 4

    ids_flat = input_ids.reshape(-1).astype(jnp.int32)
    n = ids_flat.shape[0]

    # ---- token-tile size selection -------------------------------------
    assert block_tokens % 8 == 0 and block_tokens > 0
    n_rounded = max(8, pl.cdiv(n, 8) * 8)
    if block_tokens > n_rounded:
        # Shrink to the workload; prefer >= 2 grid steps so both TensorCores
        # on v7x get work (moot on single-core v5e/v6e).
        half = ((n_rounded // 2) // 8) * 8
        block_tokens = half if half >= 8 else n_rounded
    n_pad = pl.cdiv(n, block_tokens) * block_tokens
    if n_pad != n:
        ids_flat = jnp.pad(ids_flat, (0, n_pad - n))   # pad with padding_idx 0
    num_tiles = n_pad // block_tokens

    # LayerNorm affine params stay f32 (match PyTorch precision).
    gamma2d = gamma.reshape(1, H).astype(jnp.float32)
    beta2d = beta.reshape(1, H).astype(jnp.float32)

    use_resident = (not force_hbm_gather) and (table_bytes <= resident_table_limit_bytes)

    if use_resident:
        kernel = functools.partial(_resident_table_kernel,
                                   eps=float(eps), block_tokens=block_tokens)
        in_specs = [
            pl.BlockSpec((V, H), lambda i, ids: (0, 0)),   # table VMEM-resident
            pl.BlockSpec((1, H), lambda i, ids: (0, 0)),   # gamma resident (f32)
            pl.BlockSpec((1, H), lambda i, ids: (0, 0)),   # beta resident (f32)
        ]
        scratch_shapes = [pltpu.VMEM((block_tokens, H), emb_table.dtype)]
        vmem_limit = int(min(max(32 * 2**20, 2 * table_bytes + 8 * 2**20),
                             (3 * vmem_cap) // 4))
        bytes_accessed = table_bytes + n_pad * H * itemsize + n_pad * 4 + 2 * H * 4
    else:
        gather_chunk = min(gather_chunk, block_tokens)
        gather_chunk = max(8, (gather_chunk // 8) * 8)
        while block_tokens % gather_chunk:
            gather_chunk -= 8
        kernel = functools.partial(_hbm_gather_kernel, eps=float(eps),
                                   block_tokens=block_tokens, chunk=gather_chunk)
        in_specs = [
            pl.BlockSpec(memory_space=pl.ANY),             # table stays in HBM
            pl.BlockSpec((1, H), lambda i, ids: (0, 0)),
            pl.BlockSpec((1, H), lambda i, ids: (0, 0)),
        ]
        scratch_shapes = [
            pltpu.VMEM((2, gather_chunk, H), emb_table.dtype),   # double buffer
            pltpu.SemaphoreType.DMA((2,)),                       # one sem per slot
        ]
        vmem_limit = 32 * 2**20
        bytes_accessed = 2 * n_pad * H * itemsize + n_pad * 4 + 2 * H * 4

    out = pl.pallas_call(
        kernel,
        out_shape=jax.ShapeDtypeStruct((n_pad, H), emb_table.dtype),
        grid_spec=pltpu.PrefetchScalarGridSpec(
            num_scalar_prefetch=1,
            grid=(num_tiles,),
            in_specs=in_specs,
            out_specs=pl.BlockSpec((block_tokens, H), lambda i, ids: (i, 0)),
            scratch_shapes=scratch_shapes,
        ),
        compiler_params=pltpu.CompilerParams(
            dimension_semantics=("parallel",),
            vmem_limit_bytes=int(vmem_limit),
        ),
        cost_estimate=pl.CostEstimate(
            flops=int(10 * n_pad * H),
            transcendentals=int(n_pad),
            bytes_accessed=int(bytes_accessed),
        ),
    )(ids_flat, emb_table, gamma2d, beta2d)

    return out[:n].reshape(*orig_shape, H)


if __name__ == "__main__":
    vocab_size = 100
    hidden_dim = 128        # lane-dense hidden width (TransTab default)
    batch, seq = 2, 8
    eps = 1e-5

    key = jax.random.PRNGKey(0)
    k_emb, k_ids, k_g, k_b = jax.random.split(key, 4)

    # kaiming_normal_-style init (std = sqrt(2/fan_in)); padding_idx=0 row zeroed.
    emb_table = jax.random.normal(k_emb, (vocab_size, hidden_dim), jnp.float32)
    emb_table = emb_table * (2.0 / hidden_dim) ** 0.5
    emb_table = emb_table.at[0].set(0.0)

    gamma = 1.0 + 0.1 * jax.random.normal(k_g, (hidden_dim,), jnp.float32)
    beta = 0.1 * jax.random.normal(k_b, (hidden_dim,), jnp.float32)

    input_ids = jax.random.randint(k_ids, (batch, seq), 0, vocab_size, dtype=jnp.int32)

    # Pure-JAX reference (same semantics as the PyTorch module at p_dropout=0).
    gathered = emb_table[input_ids]
    mean = gathered.mean(-1, keepdims=True)
    var = ((gathered - mean) ** 2).mean(-1, keepdims=True)
    ref = (gathered - mean) / jnp.sqrt(var + eps) * gamma + beta

    configs = [
        dict(),                                                       # resident table, auto tile (2 grid steps)
        dict(block_tokens=16),                                        # resident table, single tile
        dict(force_hbm_gather=True, block_tokens=16, gather_chunk=8), # HBM gather, 2 double-buffered chunks
        dict(force_hbm_gather=True, block_tokens=8, gather_chunk=8),  # HBM gather, 2 grid steps
    ]
    for cfg in configs:
        out = transtab_word_embedding(input_ids, emb_table, gamma, beta, eps=eps, **cfg)
        out = jax.block_until_ready(out)
        assert out.shape == (batch, seq, hidden_dim), cfg
        assert jnp.allclose(out, ref, atol=2e-5, rtol=2e-5), cfg

    print("KERNEL_OK")
</pallas_src>

<mosaic_0001>
module attributes {stable_mosaic.version = 11 : i64} {
  func.func @_resident_table_kernel(%arg0: i32, %arg1: memref<16xi32, #tpu.memory_space<smem>>, %arg2: memref<100x128xf32, #tpu.memory_space<vmem>>, %arg3: memref<1x128xf32, #tpu.memory_space<vmem>>, %arg4: memref<1x128xf32, #tpu.memory_space<vmem>>, %arg5: memref<8x128xf32, #tpu.memory_space<vmem>>, %arg6: memref<8x128xf32, #tpu.memory_space<vmem>>) attributes {dimension_semantics = [#tpu.dimension_semantics<parallel>], iteration_bounds = array<i64: 2>, scalar_prefetch = 1 : i64, scratch_operands = 1 : i64, tpu.core_type = #tpu.core_type<tc>, window_params = [{pipeline_mode = #tpu.pipeline_mode<synchronous>, transform_indices = @transform_0, window_bounds = array<i64: 100, 128>}, {pipeline_mode = #tpu.pipeline_mode<synchronous>, transform_indices = @transform_1, window_bounds = array<i64: 1, 128>}, {pipeline_mode = #tpu.pipeline_mode<synchronous>, transform_indices = @transform_2, window_bounds = array<i64: 1, 128>}, {transform_indices = @transform_3, window_bounds = array<i64: 8, 128>}]} {
    %c8_i32 = arith.constant 8 : i32
    %0 = arith.muli %arg0, %c8_i32 : i32
    %c0_i32 = arith.constant 0 : i32
    %c8_i32_0 = arith.constant 8 : i32
    %1 = arith.muli %c0_i32, %c8_i32_0 : i32
    %2 = arith.addi %0, %1 : i32
    %c0_i32_1 = arith.constant 0 : i32
    %3 = arith.addi %2, %c0_i32_1 : i32
    %4 = arith.index_cast %3 : i32 to index
    %5 = memref.load %arg1[%4] : memref<16xi32, #tpu.memory_space<smem>>
    %6 = arith.index_cast %5 : i32 to index
    %c0 = arith.constant 0 : index
    %7 = vector.load %arg2[%6, %c0] : memref<100x128xf32, #tpu.memory_space<vmem>>, vector<1x128xf32>
    %c8_i32_2 = arith.constant 8 : i32
    %8 = arith.muli %c0_i32, %c8_i32_2 : i32
    %9 = arith.addi %0, %8 : i32
    %c1_i32 = arith.constant 1 : i32
    %10 = arith.addi %9, %c1_i32 : i32
    %11 = arith.index_cast %10 : i32 to index
    %12 = memref.load %arg1[%11] : memref<16xi32, #tpu.memory_space<smem>>
    %13 = arith.index_cast %12 : i32 to index
    %c0_3 = arith.constant 0 : index
    %14 = vector.load %arg2[%13, %c0_3] : memref<100x128xf32, #tpu.memory_space<vmem>>, vector<1x128xf32>
    %c8_i32_4 = arith.constant 8 : i32
    %15 = arith.muli %c0_i32, %c8_i32_4 : i32
    %16 = arith.addi %0, %15 : i32
    %c2_i32 = arith.constant 2 : i32
    %17 = arith.addi %16, %c2_i32 : i32
    %18 = arith.index_cast %17 : i32 to index
    %19 = memref.load %arg1[%18] : memref<16xi32, #tpu.memory_space<smem>>
    %20 = arith.index_cast %19 : i32 to index
    %c0_5 = arith.constant 0 : index
    %21 = vector.load %arg2[%20, %c0_5] : memref<100x128xf32, #tpu.memory_space<vmem>>, vector<1x128xf32>
    %c8_i32_6 = arith.constant 8 : i32
    %22 = arith.muli %c0_i32, %c8_i32_6 : i32
    %23 = arith.addi %0, %22 : i32
    %c3_i32 = arith.constant 3 : i32
    %24 = arith.addi %23, %c3_i32 : i32
    %25 = arith.index_cast %24 : i32 to index
    %26 = memref.load %arg1[%25] : memref<16xi32, #tpu.memory_space<smem>>
    %27 = arith.index_cast %26 : i32 to index
    %c0_7 = arith.constant 0 : index
    %28 = vector.load %arg2[%27, %c0_7] : memref<100x128xf32, #tpu.memory_space<vmem>>, vector<1x128xf32>
    %c8_i32_8 = arith.constant 8 : i32
    %29 = arith.muli %c0_i32, %c8_i32_8 : i32
    %30 = arith.addi %0, %29 : i32
    %c4_i32 = arith.constant 4 : i32
    %31 = arith.addi %30, %c4_i32 : i32
    %32 = arith.index_cast %31 : i32 to index
    %33 = memref.load %arg1[%32] : memref<16xi32, #tpu.memory_space<smem>>
    %34 = arith.index_cast %33 : i32 to index
    %c0_9 = arith.constant 0 : index
    %35 = vector.load %arg2[%34, %c0_9] : memref<100x128xf32, #tpu.memory_space<vmem>>, vector<1x128xf32>
    %c8_i32_10 = arith.constant 8 : i32
    %36 = arith.muli %c0_i32, %c8_i32_10 : i32
    %37 = arith.addi %0, %36 : i32
    %c5_i32 = arith.constant 5 : i32
    %38 = arith.addi %37, %c5_i32 : i32
    %39 = arith.index_cast %38 : i32 to index
    %40 = memref.load %arg1[%39] : memref<16xi32, #tpu.memory_space<smem>>
    %41 = arith.index_cast %40 : i32 to index
    %c0_11 = arith.constant 0 : index
    %42 = vector.load %arg2[%41, %c0_11] : memref<100x128xf32, #tpu.memory_space<vmem>>, vector<1x128xf32>
    %c8_i32_12 = arith.constant 8 : i32
    %43 = arith.muli %c0_i32, %c8_i32_12 : i32
    %44 = arith.addi %0, %43 : i32
    %c6_i32 = arith.constant 6 : i32
    %45 = arith.addi %44, %c6_i32 : i32
    %46 = arith.index_cast %45 : i32 to index
    %47 = memref.load %arg1[%46] : memref<16xi32, #tpu.memory_space<smem>>
    %48 = arith.index_cast %47 : i32 to index
    %c0_13 = arith.constant 0 : index
    %49 = vector.load %arg2[%48, %c0_13] : memref<100x128xf32, #tpu.memory_space<vmem>>, vector<1x128xf32>
    %c8_i32_14 = arith.constant 8 : i32
    %50 = arith.muli %c0_i32, %c8_i32_14 : i32
    %51 = arith.addi %0, %50 : i32
    %c7_i32 = arith.constant 7 : i32
    %52 = arith.addi %51, %c7_i32 : i32
    %53 = arith.index_cast %52 : i32 to index
    %54 = memref.load %arg1[%53] : memref<16xi32, #tpu.memory_space<smem>>
    %55 = arith.index_cast %54 : i32 to index
    %c0_15 = arith.constant 0 : index
    %56 = vector.load %arg2[%55, %c0_15] : memref<100x128xf32, #tpu.memory_space<vmem>>, vector<1x128xf32>
    %57 = tpu.concatenate %7, %14, %21, %28, %35, %42, %49, %56 in 0 : vector<1x128xf32>, vector<1x128xf32>, vector<1x128xf32>, vector<1x128xf32>, vector<1x128xf32>, vector<1x128xf32>, vector<1x128xf32>, vector<1x128xf32> -> vector<8x128xf32>
    %c8_i32_16 = arith.constant 8 : i32
    %58 = arith.muli %c0_i32, %c8_i32_16 : i32
    %59 = tpu.assume_multiple %58, 8 : i32
    %60 = arith.index_cast %59 : i32 to index
    %c0_17 = arith.constant 0 : index
    %61 = vector.load %arg6[%60, %c0_17] : memref<8x128xf32, #tpu.memory_space<vmem>>, vector<8x128xf32>
    tpu.vector_store %arg6[%60, %c0_17], %57 {strides = array<i32>} : memref<8x128xf32, #tpu.memory_space<vmem>>, vector<8x128xf32>,
    %c1_i32_18 = arith.constant 1 : i32
    %c0_19 = arith.constant 0 : index
    %c0_20 = arith.constant 0 : index
    %62 = vector.load %arg6[%c0_19, %c0_20] : memref<8x128xf32, #tpu.memory_space<vmem>>, vector<8x128xf32>
    %cst = arith.constant dense<0.000000e+00> : vector<8xf32>
    %63 = vector.multi_reduction <add>, %62, %cst [1] : vector<8x128xf32> to vector<8xf32>
    %64 = vector.shape_cast %63 : vector<8xf32> to vector<8x1xf32>
    %cst_21 = arith.constant 1.280000e+02 : f32
    %65 = vector.broadcast %cst_21 : f32 to vector<8x1xf32>
    %66 = arith.divf %64, %65 : vector<8x1xf32>
    %67 = vector.broadcast %66 : vector<8x1xf32> to vector<8x128xf32>
    %68 = arith.subf %62, %67 : vector<8x128xf32>
    %69 = arith.mulf %68, %68 : vector<8x128xf32>
    %cst_22 = arith.constant dense<0.000000e+00> : vector<8xf32>
    %70 = vector.multi_reduction <add>, %69, %cst_22 [1] : vector<8x128xf32> to vector<8xf32>
    %71 = vector.shape_cast %70 : vector<8xf32> to vector<8x1xf32>
    %cst_23 = arith.constant 1.280000e+02 : f32
    %72 = vector.broadcast %cst_23 : f32 to vector<8x1xf32>
    %73 = arith.divf %71, %72 : vector<8x1xf32>
    %cst_24 = arith.constant 9.99999974E-6 : f32
    %74 = vector.broadcast %cst_24 : f32 to vector<8x1xf32>
    %75 = arith.addf %73, %74 : vector<8x1xf32>
    %76 = math.rsqrt %75 : vector<8x1xf32>
    %77 = vector.broadcast %76 : vector<8x1xf32> to vector<8x128xf32>
    %78 = arith.mulf %68, %77 : vector<8x128xf32>
    %c0_25 = arith.constant 0 : index
    %c0_26 = arith.constant 0 : index
    %79 = vector.load %arg3[%c0_25, %c0_26] : memref<1x128xf32, #tpu.memory_space<vmem>>, vector<1x128xf32>
    %80 = vector.broadcast %79 : vector<1x128xf32> to vector<8x128xf32>
    %81 = arith.mulf %78, %80 : vector<8x128xf32>
    %c0_27 = arith.constant 0 : index
    %c0_28 = arith.constant 0 : index
    %82 = vector.load %arg4[%c0_27, %c0_28] : memref<1x128xf32, #tpu.memory_space<vmem>>, vector<1x128xf32>
    %83 = vector.broadcast %82 : vector<1x128xf32> to vector<8x128xf32>
    %84 = arith.addf %81, %83 : vector<8x128xf32>
    %c0_29 = arith.constant 0 : index
    %c0_30 = arith.constant 0 : index
    %85 = vector.load %arg5[%c0_29, %c0_30] : memref<8x128xf32, #tpu.memory_space<vmem>>, vector<8x128xf32>
    tpu.vector_store %arg5[%c0_29, %c0_30], %84 {strides = array<i32>} : memref<8x128xf32, #tpu.memory_space<vmem>>, vector<8x128xf32>,
    return
  }
  func.func @transform_0(%arg0: i32, %arg1: memref<16xi32, #tpu.memory_space<smem>>) -> (i32, i32) {
    %c0_i32 = arith.constant 0 : i32
    %c0_i32_0 = arith.constant 0 : i32
    %c0_i32_1 = arith.constant 0 : i32
    return %c0_i32, %c0_i32_0 : i32, i32
  }
  func.func @transform_1(%arg0: i32, %arg1: memref<16xi32, #tpu.memory_space<smem>>) -> (i32, i32) {
    %c0_i32 = arith.constant 0 : i32
    %c0_i32_0 = arith.constant 0 : i32
    %c0_i32_1 = arith.constant 0 : i32
    return %c0_i32, %c0_i32_0 : i32, i32
  }
  func.func @transform_2(%arg0: i32, %arg1: memref<16xi32, #tpu.memory_space<smem>>) -> (i32, i32) {
    %c0_i32 = arith.constant 0 : i32
    %c0_i32_0 = arith.constant 0 : i32
    %c0_i32_1 = arith.constant 0 : i32
    return %c0_i32, %c0_i32_0 : i32, i32
  }
  func.func @transform_3(%arg0: i32, %arg1: memref<16xi32, #tpu.memory_space<smem>>) -> (i32, i32) {
    %c0_i32 = arith.constant 0 : i32
    %c0_i32_0 = arith.constant 0 : i32
    return %arg0, %c0_i32 : i32, i32
  }
}

</mosaic_0001>

<bundles_post_ra>
// kernel: tpu_custom_call.1
= control target key start
LH: loop header
LB: loop body
LE: loop exit
PB: predicated region body
PF: predicated region fallthrough
CT: control target
= control target key end

     0   :  { %s704_s0 = inlined_call_operand.hbm [shape: s32[16], index: 0, kind: input, shape index: {}]   ;;  %s705_s1 = inlined_call_operand.hbm [shape: f32[100,128], index: 1, kind: input, shape index: {}]   ;;  %s706_s2 = inlined_call_operand.vmem [shape: f32[1,128], index: 2, kind: input, shape index: {}]   ;;  %s707_s3 = inlined_call_operand.vmem [shape: f32[1,128], index: 3, kind: input, shape index: {}]   ;;  %s708_s4 = inlined_call_operand.hbm [shape: f32[16,128], index: 4, kind: output, shape index: {}]  }
   0x1   :  { %712 = sst [smem:[#allocation12_spill]] %s705_s1  ;;  %s416_s17 = scalar_lea.hbm %s704_s0, 16 }
   0x2   :  { %p417_p0 = scmp.ne.s32.totalorder %s704_s0, %s416_s17  ;;  %p420_p1 = scmp.lt.u32.totalorder %s416_s17, %s704_s0 }
   0x4   :  { %p422_p2 = pnand %p420_p1, %p417_p0 }
   0x6   :  { %425 = shalt.err (!%p422_p2)  }
   0x7   :  { %s524_s22 = smov [#allocation4]  }
   0x8   :  { %10 = dma.hbm_to_smem %s704_s0, 16, %s524_s22, [#allocation3] }
   0x9   :  { %498 = dma.done.wait [#allocation3], 16 }
   0xa   :  { %499 = vsyncadd [#allocation3], 4294967280 }
   0xb   :  { %12 = sfence }
   0xc   :  { %13 = vsyncpa [#allocation6], 0 }
   0xd   :  { %14 = vsyncpa [#allocation7], 0 }
   0xe   :  { %16 = vsyncpa [#allocation7 + $0x1], 0  ;;  %s566_s25 = smov 0   ;;  %s568_s26 = smov 0  }
   0xf   :  { %s570_s27 = smov 0   ;;  %s572_s28 = smov 0  }
  0x10 LB: > { %s587_s0 = sadd.s32 4294967295, %s522_s28   ;;  %s348_s29 = sadd.s32 4294967294, %s522_s28   ;;  %s522_s28 = sphi %s572_s28, %s726_s28   ;;  %s518_s27 = sphi %s570_s27, %s725_s27   ;;  %s514_s26 = sphi %s568_s26, %s724_s26   ;;  %s510_s25 = sphi %s566_s25, %s723_s25  }
  0x11   : > { %s591_s30 = sadd.s32 1, %s522_s28   ;;  %s92_s5 = sadd.s32 1, %s518_s27 }
  0x12   : > { %s89_s6 = ssub.s32 %s522_s28, %s591_s30  ;;  %p102_p3 = scmp.ne.s32.totalorder %s518_s27, %s514_s26 }
  0x13   : > { %p90_p4 = scmp.eq.s32.totalorder %s89_s6, 0  ;;  %p103_p5 = scmp.eq.s32.totalorder %s587_s0, 1 }
  0x14   : > { %p108_p6 = scmp.ne.s32.totalorder %s514_s26, %s510_s25  ;;  %p109_p7 = scmp.eq.s32.totalorder %s348_s29, 1 }
  0x15   : > { %s602_s7 = scalar_select %p90_p4, %s518_s27, %s92_s5  }
  0x16   : > { %p604_p8 = por %p103_p5, %p102_p3  ;;  %p608_p9 = por %p109_p7, %p108_p6 }
  0x17   : > { %p349_p10 = scmp.ge.s32.totalorder %s522_s28, 1  ;;  %p116_p11 = scmp.lt.s32.totalorder %s522_s28, 3 }
  0x18   : > { %s713_s8 = scalar_select %p604_p8, 1, 0 }
  0x19   : > { %s714_s9 = scalar_select %p608_p9, 1, 0 }
  0x1a   : > { %p709_p12 = scmp.eq.s32.totalorder %s587_s0, 0  ;;  %p615_p13 = pnand %p349_p10, %p116_p11 }
  0x1b   : > { %s525_s11 = smov [#allocation5]   ;;  %s717_s1 = sld [smem:[#allocation12_spill]] }
  0x1c   : > { %s715_s10 = scalar_select %p615_p13, 1, 0 }
  0x1d   : > { %s128_s12 = sshll.u32 %s525_s11, 4  ;;  %p367_p0 = pneg %p615_p13  ;;  %s129_s12 = int_to_ptr.vmem [resolvable:$true] %s128_s12 }
  0x1f   : > { %p623_p1 = pnand %p709_p12, %p367_p0 }
  0x21   : > { %s426_s16 = scalar_lea.hbm %s717_s1, 1664  ;;  %p428_p3 = pneg %p623_p1 }
  0x22   : > { %p427_p2 = scmp.ne.s32.totalorder %s717_s1, %s426_s16  ;;  %p433_p6 = scmp.lt.u32.totalorder %s426_s16, %s717_s1 }
  0x24   : > { %p429_p4 = pnand %p428_p3, %p427_p2 }
  0x26   : > { %p430_p5 = pneg %p429_p4 }
  0x28   : > { %p435_p7 = pnand %p433_p6, %p430_p5 }
  0x2a   : > { %438 = shalt.err (!%p435_p7)
}
  0x2b   : > { %s439_s21 = scalar_lea.vmem %s129_s12, 1664  ;;  %p447_p12 = scmp.lt.s32.totalorder %s129_s12, %s129_s12 }
  0x2c   : > { %p440_p10 = scmp.ne.s32.totalorder %s129_s12, %s439_s21  ;;  %p448_p9 = scmp.lt.s32.totalorder %s439_s21, %s439_s21 }
  0x2e   : > { %p442_p11 = pnand %p440_p10, %p428_p3  ;;  %p449_p8 = por %p448_p9, %p447_p12 }
  0x30   : > { %p443_p0 = pneg %p442_p11 }
  0x32   : > { %p450_p13 = pnand %p449_p8, %p443_p0 }
  0x34   : > { %453 = shalt.err (!%p450_p13)
}
  0x35   : > { %s526_s22 = smov 128   ;;  %s527_s23 = smov 8  }
  0x36   : > { %370 = dma.hbm_to_vmem [thread:$0]  (!%p623_p1), %s717_s1, 1664, %s129_s12, [#allocation6], %s526_s22, %s526_s22, %s527_s23  }
  0x37   : > { %p718_p2 = scmp.ne.s32.totalorder %s715_s10, 0 }
  0x38   : > { %p719_p4 = scmp.eq.s32.totalorder (!%p718_p2), %s587_s0, 0 }
  0x39   : > { %150 = sbr.rel (%p718_p2) target bundleno = 410 (0x19a), region = 32 }
  0x40   : > { %501 = dma.done.wait (%p719_p4), [#allocation6], 1664   ;;  %p720_p3 = pmov %p719_p4 }
  0x41   : > { %s354_s5 = sshll.u32 %s587_s0, 3  ;;  %vm222_vm0 = vcmask 1040384   ;;  %vm224_vm1 = vcmask 1041408   ;;  %vm226_vm2 = vcmask 1042432   ;;  %vm228_vm3 = vcmask 1043456   ;;  %p721_p9 = scmp.ne.s32.totalorder %s713_s8, 0 }
  0x42   : > { %503 = vsyncadd (%p720_p3), [#allocation6], 4294965632  ;;  %s170_s6 = sld [smem:[#allocation4 + %s354_s5]]  ;;  %s173_s11 = sadd.s32 1, %s354_s5  ;;  %vm230_vm4 = vcmask 1044480   ;;  %vm232_vm5 = vcmask 1045504  }
  0x43   : > { %s174_s14 = sld [smem:[#allocation4 + %s173_s11]]  ;;  %s177_s15 = sadd.s32 2, %s354_s5  ;;  %vm234_vm6 = vcmask 1046528   ;;  %v355_v30 = vld [vmem:[%s706_s2] ss:$0 sm:$0xff] }
  0x44   : > { %s178_s13 = sld [smem:[#allocation4 + %s177_s15]]  ;;  %s181_s16 = sadd.s32 3, %s354_s5  ;;  %v356_v32 = vld [vmem:[%s707_s3] ss:$0 sm:$0xff] }
  0x45   : > { %s182_s17 = sld [smem:[#allocation4 + %s181_s16]]  ;;  %s185_s18 = sadd.s32 4, %s354_s5 }
  0x46   : > { %s186_s12 = sld [smem:[#allocation4 + %s185_s18]]  ;;  %s189_s19 = sadd.s32 5, %s354_s5 }
  0x47   : > { %s190_s10 = sld [smem:[#allocation4 + %s189_s19]]  ;;  %s193_s20 = sadd.s32 6, %s354_s5 }
  0x48   : > { %s194_s21 = sld [smem:[#allocation4 + %s193_s20]]  ;;  %s197_s22 = sadd.s32 7, %s354_s5 }
  0x49   : > { %s171_s23 = scalar_lea.vmem [#allocation5], %s170_s6  ;;  %s175_s24 = scalar_lea.vmem [#allocation5], %s174_s14 }
  0x4a   : > { %v172_v0 = vld [vmem:[%s171_s23] sm:$0x1]  ;;  %s198_s29 = sld [smem:[#allocation4 + %s197_s22]]  ;;  %s179_s1 = scalar_lea.vmem [#allocation5], %s178_s13 }
  0x4b   : > { %v176_v1 = vld [vmem:[%s175_s24] sm:$0x1]  ;;  %s183_s11 = scalar_lea.vmem [#allocation5], %s182_s17  ;;  %s166_s14 = sand.u32 1, %s514_s26  }
  0x4c   : > { %v180_v2 = vld [vmem:[%s179_s1] sm:$0x1]  ;;  %v202_v3 = vrot.slane %v176_v1, 7  ;;  %s187_s15 = scalar_lea.vmem [#allocation5], %s186_s12  ;;  %s353_s13 = sshll.u32 %s166_s14, 3 }
  0x4d   : > { %v184_v4 = vld [vmem:[%s183_s11] sm:$0x1]  ;;  %v205_v5 = vrot.slane %v180_v2, 6  ;;  %s191_s5 = scalar_lea.vmem [#allocation5], %s190_s10  ;;  %s358_s19 = sshll.u32 %s587_s0, 7 }
  0x4e   : > { %v188_v6 = vld [vmem:[%s187_s15] sm:$0x1]  ;;  %v208_v7 = vrot.slane %v184_v4, 5  ;;  %v223_v8 = vsel %vm222_vm0, %v172_v0, %v202_v3  ;;  %s195_s6 = scalar_lea.vmem [#allocation5], %s194_s21  ;;  %s168_s10 = scalar_lea.vmem [#allocation8], %s353_s13 }
  0x4f   : > { %v192_v9 = vld [vmem:[%s191_s5] sm:$0x1]  ;;  %v211_v10 = vrot.slane %v188_v6, 4  ;;  %v225_v11 = vsel %vm224_vm1, %v223_v8, %v205_v5  ;;  %s281_s20 = sshll.u32 %s168_s10, 4  ;;  %s662_s23 = scalar_lea.hbm %s708_s4, %s358_s19  ;;  %s664_s20 = int_to_ptr.vmem [resolvable:$true] %s281_s20 }
  0x50   : > { %v196_v12 = vld [vmem:[%s195_s6] sm:$0x1]  ;;  %v214_v13 = vrot.slane %v192_v9, 3  ;;  %v227_v14 = vsel %vm226_vm2, %v225_v11, %v208_v7  ;;  %s199_s1 = scalar_lea.vmem [#allocation5], %s198_s29  ;;  %s268_s24 = scalar_lea.sflag [#allocation7], %s166_s14 }
  0x51   : > { %v217_v15 = vrot.slane %v196_v12, 2  ;;  %v229_v16 = vsel %vm228_vm3, %v227_v14, %v211_v10  ;;  %v200_v17 = vld [vmem:[%s199_s1] sm:$0x1]  ;;  %s454_s29 = scalar_lea.vmem %s664_s20, 128  ;;  %s528_s0 = smov [#allocation8]  }
  0x52   : > { %v231_v18 = vsel %vm230_vm4, %v229_v16, %v214_v13  ;;  %v220_v19 = vrot.slane %v200_v17, 1  ;;  %p455_p8 = scmp.ne.s32.totalorder %s664_s20, %s454_s29  ;;  %s458_s11 = sshll.u32 %s528_s0, 4  ;;  %s459_s11 = int_to_ptr.vmem [resolvable:$false] %s458_s11 }
  0x53   : > { %v233_v20 = vsel %vm232_vm5, %v231_v18, %v217_v15  ;;  %s460_s15 = scalar_lea.vmem %s459_s11, 256  ;;  %p461_p1 = scmp.lt.s32.totalorder %s664_s20, %s459_s11 }
  0x54   : > { %v235_v21 = vsel %vm234_vm6, %v233_v20, %v220_v19  ;;  %p456_p12 = pnand %p455_p8, %p721_p9  ;;  %p462_p5 = scmp.lt.s32.totalorder %s460_s15, %s454_s29 }
  0x55   : > { %238 = vadd.xlane.f32.xlu0 %v235_v21 }
  0x56   : > { %p457_p13 = pneg %p456_p12  ;;  %p463_p6 = por %p462_p5, %p461_p1 }
  0x58   : > { %p464_p7 = pnand %p463_p6, %p457_p13 }
  0xe2   : > { %v239_v22 = vpop.xlane.xlu0 %238 }
  0xe3   : > { %v241_v23 = vmul.f32 0.0078125, %v239_v22 }
  0xe5   : > { %v242_v24 = vsub.f32 %v235_v21, %v241_v23 }
  0xe7   : > { %v243_v25 = vmul.f32 %v242_v24, %v242_v24 }
  0xe9   : > { %244 = vadd.xlane.f32.xlu0 %v243_v25 }
 0x176   : > { %v245_v26 = vpop.xlane.xlu0 %244 }
 0x177   : > { %v246_v27 = vmul.f32 0.0078125, %v245_v26 }
 0x179   : > { %v247_v28 = vadd.f32 1e-05, %v246_v27 }
 0x17b   : > { %414 = vrsqrt.f32 %v247_v28 }
 0x185   : > { %v415_v29 = vpop.eup %414 }
 0x186   : > { %v249_v31 = vmul.f32 %v415_v29, %v242_v24 }
 0x188   : > { %v257_v33 = vmul.f32 %v355_v30, %v249_v31 }
 0x18a   : > { %v265_v34 = vadd.f32 %v356_v32, %v257_v33 }
 0x18c   : > { %266 = vst [vmem:[%s168_s10] sm:$0xff] %v265_v34 }
 0x18d   : > { %467 = shalt.err (!%p464_p7)
}
 0x18e   : > { %s468_s5 = scalar_lea.hbm %s662_s23, 128  ;;  %s472_s14 = scalar_lea.hbm %s708_s4, 256 }
 0x18f   : > { %p469_p10 = scmp.ne.s32.totalorder %s662_s23, %s468_s5  ;;  %p473_p2 = scmp.lt.u32.totalorder %s662_s23, %s708_s4 }
 0x190   : > { %p474_p4 = scmp.lt.u32.totalorder %s472_s14, %s468_s5  ;;  %p476_p8 = scmp.lt.u32.totalorder %s468_s5, %s662_s23 }
 0x191   : > { %p470_p11 = pnand %p469_p10, %p721_p9 }
 0x192   : > { %p475_p3 = por %p474_p4, %p473_p2 }
 0x193   : > { %p471_p0 = pneg %p470_p11 }
 0x194   : > { %p477_p12 = por %p476_p8, %p475_p3 }
 0x196   : > { %p478_p13 = pnand %p477_p12, %p471_p0 }
 0x198   : > { %481 = shalt.err (!%p478_p13)
}
 0x199   : > { %365 = dma.vmem_to_hbm [thread:$0]  (%p721_p9), %s664_s20, 128, %s662_s23, %s268_s24  }
 0x19a PF: > { %p377_p1 = scmp.ge.s32.totalorder %s522_s28, 2  ;;  %s293_s17 = sand.u32 1, %s510_s25  }
 0x19b   : > { %p722_p5 = scmp.ne.s32.totalorder %s714_s9, 0  ;;  %s294_s18 = scalar_lea.sflag [#allocation7], %s293_s17 }
 0x19d   : > { %p372_p6 = pnand %p377_p1, %p722_p5 }
 0x19f   : > { %505 = dma.done.wait (!%p372_p6), %s294_s18, 128  }
 0x1a0   : > { %507 = vsyncadd (!%p372_p6), %s294_s18, 4294967168  ;;  %p19_p7 = scmp.ge.s32.totalorder %s591_s30, 4   ;;  %s723_s25 = smov %s514_s26 }
 0x1a1   : > { %s724_s26 = smov %s518_s27  ;;  %s725_s27 = smov %s602_s7 }
 0x1a2   : > { %s726_s28 = smov %s591_s30  ;;  %21 = sbr.rel (!%p19_p7) target bundleno = 16 (0x10), region = 77 }
 0x1a9   :  { %299 = vsyncpa [#allocation6], 1 }
 0x1aa   :  { %301 = vsyncpa [#allocation6 + $0x1], 1 }
 0x1ab   :  { %302 = vsyncpa [#allocation7], 1 }
 0x1ac   :  { %304 = vsyncpa [#allocation7 + $0x1], 1 }

</bundles_post_ra>
